<compile_context>
chip_gen: v5e
topology: v5e:2x2
jax: 0.10.0
libtpu: 0.0.40
codegen_flags: <defaults>
</compile_context>

<pallas_src>
import functools

import numpy as np
import jax
import jax.numpy as jnp
from jax import lax
from jax.experimental import pallas as pl
from jax.experimental.pallas import tpu as pltpu

_LANE = 128
_MIN_PALLAS_BYTES = 1 << 20  # below ~1 MiB a standalone kernel cannot beat XLA dispatch


def _round_up(x, m):
    return ((x + m - 1) // m) * m


def _round_down_min(x, m):
    return max((x // m) * m, m)


@functools.lru_cache(maxsize=1)
def _tpu_hw_info():
    """Returns (vmem_capacity_bytes, tensorcores_per_chip) with safe fallbacks."""
    vmem = None
    try:
        info = pltpu.get_tpu_info()
        vmem = int(getattr(info, "vmem_capacity_bytes"))
    except Exception:
        vmem = None
    kind = ""
    try:
        kind = jax.devices()[0].device_kind.lower()
    except Exception:
        pass
    single_core = any(
        s in kind for s in ("v5e", "v5 lite", "v5lite", "v6e", "v6 lite", "v6lite", "trillium")
    )
    cores = 1 if single_core else 2  # v5e/v6e: 1 TC; v4/v5p/v7x: 2 TCs (conservative default)
    if vmem is None or vmem <= 0:
        big_vmem = any(s in kind for s in ("v2", "v3", "v4", "v5", "v6"))
        vmem = (128 << 20) if big_vmem else (64 << 20)  # v7x/unknown: 64 MiB per TC
    return vmem, cores


def _choose_tiling(rows, cols, x_bytes, use_packed):
    """Pick (tile_rows, tile_cols, vmem_limit_bytes) for the streaming dropout kernel."""
    vmem_cap, cores = _tpu_hw_info()
    budget = int(0.70 * vmem_cap)          # double-buffered working-set target
    vmem_limit_cap = int(0.85 * vmem_cap)  # <= ~56 MiB on v7x's 64 MiB per-TC VMEM
    target = (8 << 20) if vmem_cap > (64 << 20) else (4 << 20)  # bytes per x block

    gran = 64 if use_packed else 32        # packed unpack needs tr % 64 when tiling

    def blk_bytes(tr, tc):
        # padding-aware: lanes padded to 128, sublanes padded to 32 (covers f32/bf16/int8)
        tcp = _round_up(tc, _LANE)
        trp = _round_up(tr, 32)
        mrows = _round_up(-(-tr // 8), 32) if use_packed else trp
        return 2 * trp * tcp * x_bytes + mrows * tcp   # x block + out block + mask block

    min_tr = min(rows, gran)

    # Columns: keep full (lane-dense) width unless even a minimal row block overflows.
    tc = cols
    if 2 * blk_bytes(min_tr, tc) > budget:
        unit = 2 * blk_bytes(min_tr, _LANE)
        tc = max(_LANE, _LANE * (budget // max(unit, 1)))
        tc = min(tc, _round_up(cols, _LANE))

    # Rows: aim for ~`target` bytes per x block, shrink until double-buffered set fits.
    tcp = _round_up(tc, _LANE)
    tr = min(rows, max(gran, target // (tcp * x_bytes)))
    if tr < rows:
        tr = _round_down_min(tr, gran)
    while tr > gran and 2 * blk_bytes(tr, tc) > budget:
        tr = _round_down_min(tr - gran, gran)
    if tr >= rows:
        tr = rows

    # Megacore (>=2 TCs): split rows into an even, balanced block count so both cores
    # stay busy; skipped entirely on single-TC v5e/v6e and for small problems.
    if cores >= 2 and rows >= 2 * gran and rows * tcp * x_bytes >= (4 << 20):
        nb = -(-rows // tr)
        if nb == 1:
            nb = 2
        elif nb % 2:
            nb += 1
        tr = min(tr, _round_up(-(-rows // nb), gran))

    needed = 2 * blk_bytes(tr, tc)
    vmem_limit = min(vmem_limit_cap, max(32 << 20, needed + needed // 2))
    return tr, tc, int(vmem_limit)


# ----------------------------------------------------------------------------
# Kernels
# ----------------------------------------------------------------------------
def _dropout_kernel_packed(x_ref, pk_ref, o_ref):
    """Mask packed 8 rows per uint8 (LSB-first); unpack on idle VPU slots."""
    x = x_ref[...]
    tp, tc = pk_ref.shape
    pk = pk_ref[...].astype(jnp.int32)                        # (tp, tc)
    pk3 = lax.broadcast_in_dim(pk, (tp, 8, tc), (0, 2))       # sublane broadcast
    bit = lax.broadcasted_iota(jnp.int32, (tp, 8, tc), 1)     # bit index 0..7
    keep = jnp.bitwise_and(lax.shift_right_logical(pk3, bit), 1)
    keep = keep.reshape(tp * 8, tc)                           # layout no-op: (q,b) -> 8q+b
    o_ref[...] = jnp.where(keep != 0, x, jnp.zeros_like(x)).astype(o_ref.dtype)


def _dropout_kernel_int8(x_ref, m_ref, o_ref):
    x = x_ref[...]
    o_ref[...] = jnp.where(m_ref[...] != 0, x, jnp.zeros_like(x)).astype(o_ref.dtype)


@functools.lru_cache(maxsize=None)
def _build_dropout_call(shape, dtype_str, packed, tr, tc, vmem_limit):
    rows, cols = shape
    dtype = np.dtype(dtype_str)
    grid = (pl.cdiv(rows, tr), pl.cdiv(cols, tc))
    x_spec = pl.BlockSpec((tr, tc), lambda i, j: (i, j))
    o_spec = pl.BlockSpec((tr, tc), lambda i, j: (i, j))
    if packed:
        m_spec = pl.BlockSpec((tr // 8, tc), lambda i, j: (i, j))
        kernel = _dropout_kernel_packed
    else:
        m_spec = pl.BlockSpec((tr, tc), lambda i, j: (i, j))
        kernel = _dropout_kernel_int8
    call = pl.pallas_call(
        kernel,
        out_shape=jax.ShapeDtypeStruct((rows, cols), dtype),
        grid=grid,
        in_specs=[x_spec, m_spec],
        out_specs=o_spec,
        compiler_params=pltpu.CompilerParams(
            dimension_semantics=("parallel", "parallel"),
            vmem_limit_bytes=vmem_limit,
        ),
    )
    return jax.jit(call)


# ----------------------------------------------------------------------------
# Modules
# ----------------------------------------------------------------------------
class DropoutPallas:
    """Fixed-mask dropout: Bernoulli(1-p) mask drawn once at construction.

    training: out = x * mask (no 1/(1-p) rescale - matches the reference)
    eval:     identity
    """

    def __init__(self, p, input_size, seed=0, use_pallas="auto"):
        self.p = p
        self.training = True
        self.use_pallas = use_pallas
        gen = np.random.RandomState(seed)
        mask_np = gen.binomial(size=input_size, n=1, p=1 - p).astype(np.uint8)
        self.mask_i8 = jnp.asarray(mask_np.astype(np.int8))   # {0,1}
        self.activation = self.mask_i8                        # name kept from reference
        # Bit-packed copy (8 consecutive rows per byte, LSB-first) for the Pallas path.
        if mask_np.ndim == 2 and mask_np.shape[0] % 8 == 0:
            self.mask_packed = jnp.asarray(
                np.packbits(mask_np, axis=0, bitorder="little"))  # (rows//8, cols) uint8
        else:
            self.mask_packed = None

    def set_training(self, b):
        self.training = b

    def param(self):
        return []

    def forward(self, x):
        if not self.training:
            return x
        assert x.shape == self.mask_i8.shape, "mask/input shape mismatch"

        x_bytes = np.dtype(x.dtype).itemsize
        total_bytes = int(np.prod(x.shape)) * x_bytes
        use_pallas = (self.use_pallas if isinstance(self.use_pallas, bool)
                      else total_bytes >= _MIN_PALLAS_BYTES)
        if x.ndim != 2 or not use_pallas:
            # Tiny activations: dispatch + grid-step overhead dominates; let XLA fuse it.
            # TODO(synk): when this Dropout follows another Pallas kernel in the
            # Sequential, fuse `* mask` into that kernel's epilogue instead of a pass.
            return jnp.where(self.mask_i8 != 0, x, jnp.zeros_like(x))

        rows, cols = x.shape
        packed = self.mask_packed is not None
        tr, tc, vmem_limit = _choose_tiling(rows, cols, x_bytes, packed)
        if packed and tr % 8 != 0:  # safety net; current tiling always satisfies this
            packed = False
            tr, tc, vmem_limit = _choose_tiling(rows, cols, x_bytes, False)

        call = _build_dropout_call((rows, cols), str(x.dtype), packed, tr, tc, vmem_limit)
        mask = self.mask_packed if packed else self.mask_i8
        return call(x, mask)

    __call__ = forward


class SequentialPallas:
    """Forward-only Sequential container matching the reference semantics."""

    def __init__(self, target=None, d_loss=None, loss=None):
        self.modules = []
        self.target = target
        self.d_loss = d_loss
        self.loss = loss
        self.output = None
        self.monitor_loss = []

    def add(self, module):
        self.modules.append(module)

    def remove(self):
        self.modules = self.modules[0:-2]

    def forward(self, input):
        next_in = input
        for i, _ in enumerate(self.modules):
            next_in = self.modules[i].forward(next_in)
        self.output = next_in
        return self.output

    # TODO(synk): backward/update/display/save_params are host-side training
    # bookkeeping (loss callbacks, JSON dump) with no Pallas equivalent; forward only.


if __name__ == "__main__":
    key = jax.random.PRNGKey(0)
    k1, k2 = jax.random.split(key)

    # --- 1) Bit-packed-mask Pallas kernel inside the Sequential container ---
    rows, cols = 128, 256
    drop = DropoutPallas(p=0.5, input_size=(rows, cols), seed=0, use_pallas=True)
    net = SequentialPallas(target=None, d_loss=None, loss=None)
    net.add(drop)

    x = jax.random.normal(k1, (rows, cols), dtype=jnp.float32)
    net.forward(x)
    out = jax.block_until_ready(net.output)
    ref = x * drop.mask_i8.astype(jnp.float32)
    assert out.shape == x.shape and out.dtype == x.dtype
    assert jnp.array_equal(out, ref), "f32 packed-mask mismatch vs reference"

    # bf16 path exercises the output-dtype cast in the same kernel.
    xb = x.astype(jnp.bfloat16)
    outb = jax.block_until_ready(drop.forward(xb))
    refb = xb * drop.mask_i8.astype(jnp.bfloat16)
    assert outb.dtype == jnp.bfloat16 and jnp.array_equal(outb, refb), "bf16 mismatch"

    # --- 2) int8-mask kernel path (rows not a multiple of 8) ---
    drop2 = DropoutPallas(p=0.3, input_size=(60, 256), seed=1, use_pallas=True)
    x2 = jax.random.normal(k2, (60, 256), dtype=jnp.float32)
    out2 = jax.block_until_ready(drop2.forward(x2))
    ref2 = x2 * drop2.mask_i8.astype(jnp.float32)
    assert jnp.array_equal(out2, ref2), "int8-mask kernel mismatch vs reference"

    # --- 3) auto mode on a tiny input: plain-XLA fallback + eval-mode identity ---
    drop3 = DropoutPallas(p=0.5, input_size=(64, 128), seed=2)  # use_pallas="auto"
    x3 = jax.random.normal(key, (64, 128), dtype=jnp.float32)
    out3 = jax.block_until_ready(drop3.forward(x3))
    ref3 = x3 * drop3.mask_i8.astype(jnp.float32)
    assert jnp.array_equal(out3, ref3), "XLA fallback mismatch vs reference"
    drop3.set_training(False)
    assert jnp.array_equal(jax.block_until_ready(drop3.forward(x3)), x3), "eval identity"

    print("KERNEL_OK")
</pallas_src>

<mosaic_0001>
module attributes {stable_mosaic.version = 11 : i64} {
  func.func @_dropout_kernel_packed(%arg0: i32, %arg1: i32, %arg2: memref<128x256xf32, #tpu.memory_space<vmem>>, %arg3: memref<16x256xi8, #tpu.memory_space<vmem>>, %arg4: memref<128x256xf32, #tpu.memory_space<vmem>>) attributes {dimension_semantics = [#tpu.dimension_semantics<parallel>, #tpu.dimension_semantics<parallel>], iteration_bounds = array<i64: 1, 1>, scalar_prefetch = 0 : i64, scratch_operands = 0 : i64, tpu.core_type = #tpu.core_type<tc>, window_params = [{transform_indices = @transform_0, window_bounds = array<i64: 128, 256>}, {transform_indices = @transform_1, window_bounds = array<i64: 16, 256>}, {transform_indices = @transform_2, window_bounds = array<i64: 128, 256>}]} {
    %c0 = arith.constant 0 : index
    %c0_0 = arith.constant 0 : index
    %0 = vector.load %arg2[%c0, %c0_0] : memref<128x256xf32, #tpu.memory_space<vmem>>, vector<128x256xf32>
    %c0_1 = arith.constant 0 : index
    %c0_2 = arith.constant 0 : index
    %1 = vector.load %arg3[%c0_1, %c0_2] : memref<16x256xi8, #tpu.memory_space<vmem>>, vector<16x256xi8>
    %2 = arith.extui %1 : vector<16x256xi8> to vector<16x256xi32>
    %3 = vector.shape_cast %2 : vector<16x256xi32> to vector<16x1x256xi32>
    %4 = vector.broadcast %3 : vector<16x1x256xi32> to vector<16x8x256xi32>
    %5 = tpu.iota {dimensions = array<i32: 1>} : vector<16x8x256xi32>
    %6 = arith.shrui %4, %5 : vector<16x8x256xi32>
    %c1_i32 = arith.constant 1 : i32
    %7 = vector.broadcast %c1_i32 : i32 to vector<16x8x256xi32>
    %8 = arith.andi %6, %7 : vector<16x8x256xi32>
    %9 = vector.shape_cast %8 : vector<16x8x256xi32> to vector<128x256xi32>
    %c0_i32 = arith.constant 0 : i32
    %10 = vector.broadcast %c0_i32 : i32 to vector<128x256xi32>
    %11 = arith.cmpi ne, %9, %10 : vector<128x256xi32>
    %cst = arith.constant 0.000000e+00 : f32
    %12 = vector.broadcast %cst : f32 to vector<128x256xf32>
    %13 = arith.select %11, %0, %12 : vector<128x256xi1>, vector<128x256xf32>
    %c0_3 = arith.constant 0 : index
    %c0_4 = arith.constant 0 : index
    %14 = vector.load %arg4[%c0_3, %c0_4] : memref<128x256xf32, #tpu.memory_space<vmem>>, vector<128x256xf32>
    tpu.vector_store %arg4[%c0_3, %c0_4], %13 {strides = array<i32>} : memref<128x256xf32, #tpu.memory_space<vmem>>, vector<128x256xf32>,
    return
  }
  func.func @transform_0(%arg0: i32, %arg1: i32) -> (i32, i32) {
    %c0_i32 = arith.constant 0 : i32
    return %arg0, %arg1 : i32, i32
  }
  func.func @transform_1(%arg0: i32, %arg1: i32) -> (i32, i32) {
    %c0_i32 = arith.constant 0 : i32
    return %arg0, %arg1 : i32, i32
  }
  func.func @transform_2(%arg0: i32, %arg1: i32) -> (i32, i32) {
    %c0_i32 = arith.constant 0 : i32
    return %arg0, %arg1 : i32, i32
  }
}

</mosaic_0001>

<bundles_post_ra>
// kernel: tpu_custom_call.1
= control target key start
LH: loop header
LB: loop body
LE: loop exit
PB: predicated region body
PF: predicated region fallthrough
CT: control target
= control target key end

     0   :  { %7 = vsyncpa [#allocation3], 0  ;;  %s580_s0 = inlined_call_operand.hbm [shape: f32[128,256], index: 0, kind: input, shape index: {}]   ;;  %s581_s1 = inlined_call_operand.hbm [shape: u8[16,256], index: 1, kind: input, shape index: {}]   ;;  %s582_s2 = inlined_call_operand.hbm [shape: f32[128,256], index: 2, kind: output, shape index: {}]  }
   0x1   :  { %8 = vsyncpa [#allocation6], 0 }
   0x2   :  { %9 = vsyncpa [#allocation4], 0  ;;  %s14_s11 = sshll.u32 %s580_s0, 4  ;;  %s431_s12 = smov [#allocation2]   ;;  %s15_s11 = int_to_ptr.hbm [resolvable:$true] %s14_s11 }
   0x3   :  { %s16_s13 = sshll.u32 %s431_s12, 4  ;;  %s27_s16 = sshll.u32 %s581_s1, 4  ;;  %s17_s13 = int_to_ptr.vmem [resolvable:$true] %s16_s13  ;;  %s28_s16 = int_to_ptr.hbm [resolvable:$true] %s27_s16 }
   0x4   :  { %s432_s17 = smov 256   ;;  %s433_s18 = smov 16  }
   0x5   :  { %22 = dma.hbm_to_vmem [thread:$0]  %s15_s11, 4096, %s17_s13, [#allocation3], %s432_s17, %s432_s17, %s433_s18  }
   0x6   :  { %s434_s19 = smov [#allocation5]   ;;  %s435_s21 = smov 64  }
   0x7   :  { %s29_s20 = sshll.u32 %s434_s19, 4  ;;  %s436_s0 = smov 4   ;;  %s30_s20 = int_to_ptr.vmem [resolvable:$true] %s29_s20 }
   0x8   :  { %35 = dma.hbm_to_vmem [thread:$0]  %s28_s16, 128, %s30_s20, [#allocation6], %s435_s21, %s435_s21, %s436_s0  }
   0x9   :  { %425 = dma.done.wait [#allocation3], 4096  }
   0xa   :  { %426 = vsyncadd [#allocation3], 4294963200 }
   0xb   :  { %427 = dma.done.wait [#allocation6], 128  }
   0xc   :  { %428 = vsyncadd [#allocation6], 4294967168  ;;  %v341_v0 = vld [vmem:[#allocation5] sm:$0xff]   ;;  %v158_v4 = vlaneseq  ;;  %vm88_vm0 = vcmask 1040384   ;;  %vm90_vm1 = vcmask 1041409   ;;  %vm93_vm2 = vcmask 1042434  }
   0xd   :  { %v342_v1 = vunpack.c.0.s8 %v341_v0  ;;  %v343_v2 = vunpack.c.1.s8 %v341_v0  ;;  %v345_v3 = vunpack.c.3.s8 %v341_v0  ;;  %v344_v5 = vunpack.c.2.s8 %v341_v0  ;;  %v44_v33 = vld [vmem:[#allocation2] sm:$0xff]  ;;  %v45_v35 = vld [vmem:[#allocation2 + $0x8] sm:$0xff]  ;;  %v46_v39 = vld [vmem:[#allocation2 + $0x10] sm:$0xff]  ;;  %s437_s1 = smov [#allocation7]   ;;  %s326_s25 = sshll.u32 %s582_s2, 4  ;;  %s327_s25 = int_to_ptr.hbm [resolvable:$true] %s326_s25 }
   0xe   :  { %vm96_vm3 = vcmask 1043459   ;;  %vm99_vm4 = vcmask 1044484   ;;  %vm102_vm5 = vcmask 1045509   ;;  %v466_v10 = vshrl.u32 %v158_v4, 7  ;;  %v47_v46 = vld [vmem:[#allocation2 + $0x18] sm:$0xff]  ;;  %v48_v48 = vld [vmem:[#allocation2 + $0x20] sm:$0xff] }
   0xf   :  { %v462_v6 = vand.u32 255, %v342_v1  ;;  %v83_v7 = vand.u32 255, %v343_v2  ;;  %v85_v8 = vand.u32 255, %v345_v3  ;;  %vm105_vm6 = vcmask 1046534   ;;  %v49_v52 = vld [vmem:[#allocation2 + $0x28] sm:$0xff]  ;;  %v50_v54 = vld [vmem:[#allocation2 + $0x30] sm:$0xff] }
  0x10   :  { %v468_v11 = vand.u32 255, %v344_v5  ;;  %vm108_vm7 = vcmask 1046528   ;;  %v51_v56 = vld [vmem:[#allocation2 + $0x38] sm:$0xff]  ;;  %s324_s22 = sshll.u32 %s437_s1, 4  ;;  %s325_s22 = int_to_ptr.vmem [resolvable:$true] %s324_s22 }
  0x11   :  { %v464_v9 = vrot.slane %v83_v7, 7  ;;  %v470_v12 = vrot.slane %v85_v8, 7 }
  0x13   :  { %v89_v13 = vsel %vm88_vm0, %v462_v6, %v464_v9  ;;  %v91_v14 = vsel %vm90_vm1, %v462_v6, %v464_v9  ;;  %v94_v15 = vsel %vm93_vm2, %v462_v6, %v464_v9  ;;  %v97_v16 = vsel %vm96_vm3, %v462_v6, %v464_v9 }
  0x14   :  { %v126_v17 = vperm.slane %v89_v13, 0  ;;  %v127_v18 = vperm.slane %v89_v13, 1  ;;  %v92_v19 = vrot.slane %v91_v14, 1  ;;  %v95_v20 = vrot.slane %v94_v15, 2 }
  0x15   :  { %v98_v21 = vrot.slane %v97_v16, 3  ;;  %v487_v22 = vsel %vm99_vm4, %v462_v6, %v464_v9  ;;  %v492_v23 = vsel %vm102_vm5, %v462_v6, %v464_v9  ;;  %v497_v24 = vsel %vm105_vm6, %v462_v6, %v464_v9 }
  0x16   :  { %v160_v25 = vshrl.u32 %v126_v17, %v466_v10  ;;  %v161_v26 = vshrl.u32 %v127_v18, %v466_v10  ;;  %v128_v27 = vperm.slane %v92_v19, 0  ;;  %v129_v28 = vperm.slane %v92_v19, 1 }
  0x17   :  { %v130_v29 = vperm.slane %v95_v20, 0  ;;  %v131_v30 = vperm.slane %v95_v20, 1  ;;  %v132_v31 = vperm.slane %v98_v21, 0  ;;  %v133_v32 = vperm.slane %v98_v21, 1  ;;  %v52_v21 = vld [vmem:[#allocation2 + $0x40] sm:$0xff] }
  0x18   :  { %v192_v34 = vand.u32 1, %v160_v25  ;;  %v193_v36 = vand.u32 1, %v161_v26  ;;  %v162_v37 = vshrl.u32 %v128_v27, %v466_v10  ;;  %v163_v38 = vshrl.u32 %v129_v28, %v466_v10 }
  0x19   :  { %v164_v40 = vshrl.u32 %v130_v29, %v466_v10  ;;  %v165_v41 = vshrl.u32 %v131_v30, %v466_v10  ;;  %v166_v42 = vshrl.u32 %v132_v31, %v466_v10  ;;  %v167_v43 = vshrl.u32 %v133_v32, %v466_v10  ;;  %v54_v29 = vld [vmem:[#allocation2 + $0x50] sm:$0xff]  ;;  %v55_v31 = vld [vmem:[#allocation2 + $0x58] sm:$0xff] }
  0x1a   :  { %vm224_vm8 = vcmp.ne.s32.totalorder %v192_v34, 0  ;;  %vm507_vm9 = vcmp.ne.s32.totalorder %v193_v36, 0  ;;  %v194_v45 = vand.u32 1, %v162_v37  ;;  %v195_v47 = vand.u32 1, %v163_v38  ;;  %v56_v37 = vld [vmem:[#allocation2 + $0x60] sm:$0xff]  ;;  %v57_v38 = vld [vmem:[#allocation2 + $0x68] sm:$0xff] }
  0x1b   :  { %v256_v49 = vsel %vm224_vm8, %v44_v33, 0.0  ;;  %v257_v50 = vsel %vm507_vm9, %v45_v35, 0.0  ;;  %v196_v51 = vand.u32 1, %v164_v40  ;;  %v197_v53 = vand.u32 1, %v165_v41 }
  0x1c   :  { %288 = vst [vmem:[#allocation7] sm:$0xff] %v256_v49  ;;  %vm226_vm10 = vcmp.ne.s32.totalorder %v194_v45, 0  ;;  %vm227_vm11 = vcmp.ne.s32.totalorder %v195_v47, 0  ;;  %v198_v55 = vand.u32 1, %v166_v42  ;;  %v199_v57 = vand.u32 1, %v167_v43  ;;  %v58_v43 = vld [vmem:[#allocation2 + $0x70] sm:$0xff] }
  0x1d   :  { %289 = vst [vmem:[#allocation7 + $0x8] sm:$0xff] %v257_v50  ;;  %v258_v58 = vsel %vm226_vm10, %v46_v39, 0.0  ;;  %v259_v59 = vsel %vm227_vm11, %v47_v46, 0.0  ;;  %vm228_vm12 = vcmp.ne.s32.totalorder %v196_v51, 0  ;;  %vm229_vm13 = vcmp.ne.s32.totalorder %v197_v53, 0  ;;  %v59_v45 = vld [vmem:[#allocation2 + $0x78] sm:$0xff] }
  0x1e   :  { %290 = vst [vmem:[#allocation7 + $0x10] sm:$0xff] %v258_v58  ;;  %v260_v60 = vsel %vm228_vm12, %v48_v48, 0.0  ;;  %v261_v61 = vsel %vm229_vm13, %v49_v52, 0.0  ;;  %vm230_vm14 = vcmp.ne.s32.totalorder %v198_v55, 0  ;;  %vm231_vm15 = vcmp.ne.s32.totalorder %v199_v57, 0  ;;  %v60_v55 = vld [vmem:[#allocation2 + $0x80] sm:$0xff] }
  0x1f   :  { %291 = vst [vmem:[#allocation7 + $0x18] sm:$0xff] %v259_v59  ;;  %v262_v62 = vsel %vm230_vm14, %v50_v54, 0.0  ;;  %v263_v63 = vsel %vm231_vm15, %v51_v56, 0.0  ;;  %v101_v0 = vrot.slane %v487_v22, 4  ;;  %v104_v1 = vrot.slane %v492_v23, 5  ;;  %v53_v22 = vld [vmem:[#allocation2 + $0x48] sm:$0xff] }
  0x20   :  { %292 = vst [vmem:[#allocation7 + $0x20] sm:$0xff] %v260_v60  ;;  %v107_v2 = vrot.slane %v497_v24, 6  ;;  %v109_v3 = vsel %vm108_vm7, %v464_v9, %v462_v6  ;;  %v522_v4 = vsel %vm88_vm0, %v468_v11, %v470_v12  ;;  %v527_v5 = vsel %vm90_vm1, %v468_v11, %v470_v12 }
  0x21   :  { %293 = vst [vmem:[#allocation7 + $0x28] sm:$0xff] %v261_v61  ;;  %v134_v7 = vperm.slane %v101_v0, 0  ;;  %v135_v8 = vperm.slane %v101_v0, 1  ;;  %v136_v13 = vperm.slane %v104_v1, 0  ;;  %v137_v14 = vperm.slane %v104_v1, 1 }
  0x22   :  { %294 = vst [vmem:[#allocation7 + $0x30] sm:$0xff] %v262_v62  ;;  %v138_v15 = vperm.slane %v107_v2, 0  ;;  %v139_v16 = vperm.slane %v107_v2, 1  ;;  %v110_v17 = vrot.slane %v109_v3, 7  ;;  %v142_v6 = vperm.slane %v522_v4, 0  ;;  %v61_v62 = vld [vmem:[#allocation2 + $0x88] sm:$0xff] }
  0x23   :  { %295 = vst [vmem:[#allocation7 + $0x38] sm:$0xff] %v263_v63  ;;  %v168_v9 = vshrl.u32 %v134_v7, %v466_v10  ;;  %v169_v18 = vshrl.u32 %v135_v8, %v466_v10  ;;  %v170_v19 = vshrl.u32 %v136_v13, %v466_v10  ;;  %v171_v20 = vshrl.u32 %v137_v14, %v466_v10 }
  0x24   :  { %v172_v23 = vshrl.u32 %v138_v15, %v466_v10  ;;  %v173_v24 = vshrl.u32 %v139_v16, %v466_v10  ;;  %v140_v25 = vperm.slane %v110_v17, 0  ;;  %v141_v26 = vperm.slane %v110_v17, 1  ;;  %v62_v15 = vld [vmem:[#allocation2 + $0x90] sm:$0xff]  ;;  %v63_v17 = vld [vmem:[#allocation2 + $0x98] sm:$0xff] }
  0x25   :  { %v200_v27 = vand.u32 1, %v168_v9  ;;  %v201_v28 = vand.u32 1, %v169_v18  ;;  %v202_v30 = vand.u32 1, %v170_v19  ;;  %v203_v32 = vand.u32 1, %v171_v20 }
  0x26   :  { %v204_v33 = vand.u32 1, %v172_v23  ;;  %v205_v34 = vand.u32 1, %v173_v24  ;;  %v174_v35 = vshrl.u32 %v140_v25, %v466_v10  ;;  %v175_v36 = vshrl.u32 %v141_v26, %v466_v10 }
  0x27   :  { %vm232_vm0 = vcmp.ne.s32.totalorder %v200_v27, 0  ;;  %vm233_vm1 = vcmp.ne.s32.totalorder %v201_v28, 0  ;;  %vm234_vm8 = vcmp.ne.s32.totalorder %v202_v30, 0  ;;  %vm235_vm9 = vcmp.ne.s32.totalorder %v203_v32, 0  ;;  %v65_v27 = vld [vmem:[#allocation2 + $0xa8] sm:$0xff] }
  0x28   :  { %v264_v39 = vsel %vm232_vm0, %v52_v21, 0.0  ;;  %v265_v40 = vsel %vm233_vm1, %v53_v22, 0.0  ;;  %v266_v41 = vsel %vm234_vm8, %v54_v29, 0.0  ;;  %v267_v42 = vsel %vm235_vm9, %v55_v31, 0.0  ;;  %v64_v22 = vld [vmem:[#allocation2 + $0xa0] sm:$0xff]  ;;  %v66_v29 = vld [vmem:[#allocation2 + $0xb0] sm:$0xff] }
  0x29   :  { %296 = vst [vmem:[#allocation7 + $0x40] sm:$0xff] %v264_v39  ;;  %vm236_vm10 = vcmp.ne.s32.totalorder %v204_v33, 0  ;;  %vm237_vm11 = vcmp.ne.s32.totalorder %v205_v34, 0  ;;  %v206_v44 = vand.u32 1, %v174_v35  ;;  %v207_v46 = vand.u32 1, %v175_v36  ;;  %v67_v31 = vld [vmem:[#allocation2 + $0xb8] sm:$0xff] }
  0x2a   :  { %297 = vst [vmem:[#allocation7 + $0x48] sm:$0xff] %v265_v40  ;;  %v268_v47 = vsel %vm236_vm10, %v56_v37, 0.0  ;;  %v269_v48 = vsel %vm237_vm11, %v57_v38, 0.0  ;;  %v176_v49 = vshrl.u32 %v142_v6, %v466_v10  ;;  %v143_v50 = vperm.slane %v522_v4, 1 }
  0x2b   :  { %298 = vst [vmem:[#allocation7 + $0x50] sm:$0xff] %v266_v41  ;;  %vm238_vm12 = vcmp.ne.s32.totalorder %v206_v44, 0  ;;  %vm239_vm13 = vcmp.ne.s32.totalorder %v207_v46, 0  ;;  %v113_v51 = vrot.slane %v527_v5, 1  ;;  %v114_v52 = vsel %vm93_vm2, %v468_v11, %v470_v12  ;;  %v68_v44 = vld [vmem:[#allocation2 + $0xc0] sm:$0xff] }
  0x2c   :  { %299 = vst [vmem:[#allocation7 + $0x58] sm:$0xff] %v267_v42  ;;  %v270_v53 = vsel %vm238_vm12, %v58_v43, 0.0  ;;  %v271_v54 = vsel %vm239_vm13, %v59_v45, 0.0  ;;  %v208_v56 = vand.u32 1, %v176_v49  ;;  %v177_v57 = vshrl.u32 %v143_v50, %v466_v10 }
  0x2d   :  { %300 = vst [vmem:[#allocation7 + $0x60] sm:$0xff] %v268_v47  ;;  %v144_v58 = vperm.slane %v113_v51, 0  ;;  %v145_v59 = vperm.slane %v113_v51, 1  ;;  %v115_v60 = vrot.slane %v114_v52, 2  ;;  %v116_v61 = vsel %vm96_vm3, %v468_v11, %v470_v12 }
  0x2e   :  { %301 = vst [vmem:[#allocation7 + $0x68] sm:$0xff] %v269_v48  ;;  %vm240_vm14 = vcmp.ne.s32.totalorder %v208_v56, 0  ;;  %v209_v63 = vand.u32 1, %v177_v57  ;;  %v117_v0 = vrot.slane %v116_v61, 3  ;;  %v118_v1 = vsel %vm99_vm4, %v468_v11, %v470_v12  ;;  %v69_v48 = vld [vmem:[#allocation2 + $0xc8] sm:$0xff]  ;;  %v71_v57 = vld [vmem:[#allocation2 + $0xd8] sm:$0xff] }
  0x2f   :  { %302 = vst [vmem:[#allocation7 + $0x70] sm:$0xff] %v270_v53  ;;  %v272_v2 = vsel %vm240_vm14, %v60_v55, 0.0  ;;  %v178_v3 = vshrl.u32 %v144_v58, %v466_v10  ;;  %v179_v4 = vshrl.u32 %v145_v59, %v466_v10  ;;  %v146_v5 = vperm.slane %v115_v60, 0  ;;  %v70_v55 = vld [vmem:[#allocation2 + $0xd0] sm:$0xff] }
  0x30   :  { %303 = vst [vmem:[#allocation7 + $0x78] sm:$0xff] %v271_v54  ;;  %vm241_vm2 = vcmp.ne.s32.totalorder %v209_v63, 0  ;;  %v147_v7 = vperm.slane %v115_v60, 1  ;;  %v148_v8 = vperm.slane %v117_v0, 0  ;;  %v149_v13 = vperm.slane %v117_v0, 1 }
  0x31   :  { %304 = vst [vmem:[#allocation7 + $0x80] sm:$0xff] %v272_v2  ;;  %v273_v14 = vsel %vm241_vm2, %v61_v62, 0.0  ;;  %v210_v16 = vand.u32 1, %v178_v3  ;;  %v211_v6 = vand.u32 1, %v179_v4  ;;  %v180_v9 = vshrl.u32 %v146_v5, %v466_v10  ;;  %v72_v4 = vld [vmem:[#allocation2 + $0xe0] sm:$0xff] }
  0x32   :  { %305 = vst [vmem:[#allocation7 + $0x88] sm:$0xff] %v273_v14  ;;  %v181_v18 = vshrl.u32 %v147_v7, %v466_v10  ;;  %v182_v19 = vshrl.u32 %v148_v8, %v466_v10  ;;  %v183_v20 = vshrl.u32 %v149_v13, %v466_v10  ;;  %v119_v21 = vrot.slane %v118_v1, 4  ;;  %v73_v7 = vld [vmem:[#allocation2 + $0xe8] sm:$0xff]  ;;  %v74_v13 = vld [vmem:[#allocation2 + $0xf0] sm:$0xff] }
  0x33   :  { %vm242_vm3 = vcmp.ne.s32.totalorder %v210_v16, 0  ;;  %vm243_vm4 = vcmp.ne.s32.totalorder %v211_v6, 0  ;;  %v212_v23 = vand.u32 1, %v180_v9  ;;  %v120_v24 = vsel %vm102_vm5, %v468_v11, %v470_v12 }
  0x34   :  { %v274_v25 = vsel %vm242_vm3, %v62_v15, 0.0  ;;  %v275_v26 = vsel %vm243_vm4, %v63_v17, 0.0  ;;  %v213_v28 = vand.u32 1, %v181_v18  ;;  %v214_v30 = vand.u32 1, %v182_v19  ;;  %v75_v15 = vld [vmem:[#allocation2 + $0xf8] sm:$0xff] }
  0x35   :  { %306 = vst [vmem:[#allocation7 + $0x90] sm:$0xff] %v274_v25  ;;  %vm244_vm15 = vcmp.ne.s32.totalorder %v212_v23, 0  ;;  %v215_v32 = vand.u32 1, %v183_v20  ;;  %v150_v33 = vperm.slane %v119_v21, 0  ;;  %v151_v34 = vperm.slane %v119_v21, 1 }
  0x36   :  { %307 = vst [vmem:[#allocation7 + $0x98] sm:$0xff] %v275_v26  ;;  %v276_v35 = vsel %vm244_vm15, %v64_v22, 0.0  ;;  %vm245_vm0 = vcmp.ne.s32.totalorder %v213_v28, 0  ;;  %vm246_vm1 = vcmp.ne.s32.totalorder %v214_v30, 0  ;;  %v121_v36 = vrot.slane %v120_v24, 5 }
  0x37   :  { %308 = vst [vmem:[#allocation7 + $0xa0] sm:$0xff] %v276_v35  ;;  %v277_v37 = vsel %vm245_vm0, %v65_v27, 0.0  ;;  %v278_v38 = vsel %vm246_vm1, %v66_v29, 0.0  ;;  %vm247_vm5 = vcmp.ne.s32.totalorder %v215_v32, 0  ;;  %v184_v39 = vshrl.u32 %v150_v33, %v466_v10 }
  0x38   :  { %309 = vst [vmem:[#allocation7 + $0xa8] sm:$0xff] %v277_v37  ;;  %v279_v40 = vsel %vm247_vm5, %v67_v31, 0.0  ;;  %v185_v41 = vshrl.u32 %v151_v34, %v466_v10  ;;  %v152_v42 = vperm.slane %v121_v36, 0  ;;  %v153_v43 = vperm.slane %v121_v36, 1 }
  0x39   :  { %310 = vst [vmem:[#allocation7 + $0xb0] sm:$0xff] %v278_v38  ;;  %v216_v45 = vand.u32 1, %v184_v39  ;;  %v122_v46 = vsel %vm105_vm6, %v468_v11, %v470_v12  ;;  %v124_v47 = vsel %vm108_vm7, %v470_v12, %v468_v11 }
  0x3a   :  { %311 = vst [vmem:[#allocation7 + $0xb8] sm:$0xff] %v279_v40  ;;  %v217_v49 = vand.u32 1, %v185_v41  ;;  %v186_v50 = vshrl.u32 %v152_v42, %v466_v10  ;;  %v187_v51 = vshrl.u32 %v153_v43, %v466_v10  ;;  %v123_v52 = vrot.slane %v122_v46, 6 }
  0x3b   :  { %vm248_vm8 = vcmp.ne.s32.totalorder %v216_v45, 0  ;;  %v125_v53 = vrot.slane %v124_v47, 7 }
  0x3c   :  { %v280_v54 = vsel %vm248_vm8, %v68_v44, 0.0  ;;  %vm249_vm9 = vcmp.ne.s32.totalorder %v217_v49, 0  ;;  %v218_v56 = vand.u32 1, %v186_v50  ;;  %v219_v58 = vand.u32 1, %v187_v51 }
  0x3d   :  { %312 = vst [vmem:[#allocation7 + $0xc0] sm:$0xff] %v280_v54  ;;  %v281_v59 = vsel %vm249_vm9, %v69_v48, 0.0  ;;  %v154_v60 = vperm.slane %v123_v52, 0  ;;  %v155_v11 = vperm.slane %v123_v52, 1  ;;  %v156_v12 = vperm.slane %v125_v53, 0 }
  0x3e   :  { %313 = vst [vmem:[#allocation7 + $0xc8] sm:$0xff] %v281_v59  ;;  %vm250_vm6 = vcmp.ne.s32.totalorder %v218_v56, 0  ;;  %vm251_vm7 = vcmp.ne.s32.totalorder %v219_v58, 0  ;;  %v157_v61 = vperm.slane %v125_v53, 1 }
  0x3f   :  { %v282_v62 = vsel %vm250_vm6, %v70_v55, 0.0  ;;  %v283_v63 = vsel %vm251_vm7, %v71_v57, 0.0  ;;  %v188_v0 = vshrl.u32 %v154_v60, %v466_v10  ;;  %v189_v1 = vshrl.u32 %v155_v11, %v466_v10 }
  0x40   :  { %314 = vst [vmem:[#allocation7 + $0xd0] sm:$0xff] %v282_v62  ;;  %v190_v2 = vshrl.u32 %v156_v12, %v466_v10  ;;  %v191_v3 = vshrl.u32 %v157_v61, %v466_v10 }
  0x41   :  { %315 = vst [vmem:[#allocation7 + $0xd8] sm:$0xff] %v283_v63  ;;  %v220_v5 = vand.u32 1, %v188_v0  ;;  %v221_v8 = vand.u32 1, %v189_v1 }
  0x42   :  { %v222_v14 = vand.u32 1, %v190_v2  ;;  %v223_v16 = vand.u32 1, %v191_v3 }
  0x43   :  { %vm252_vm10 = vcmp.ne.s32.totalorder %v220_v5, 0  ;;  %vm253_vm11 = vcmp.ne.s32.totalorder %v221_v8, 0 }
  0x44   :  { %v284_v17 = vsel %vm252_vm10, %v72_v4, 0.0  ;;  %v285_v6 = vsel %vm253_vm11, %v73_v7, 0.0  ;;  %vm254_vm12 = vcmp.ne.s32.totalorder %v222_v14, 0  ;;  %vm255_vm13 = vcmp.ne.s32.totalorder %v223_v16, 0 }
  0x45   :  { %316 = vst [vmem:[#allocation7 + $0xe0] sm:$0xff] %v284_v17  ;;  %v286_v10 = vsel %vm254_vm12, %v74_v13, 0.0  ;;  %v287_v9 = vsel %vm255_vm13, %v75_v15, 0.0 }
  0x46   :  { %317 = vst [vmem:[#allocation7 + $0xe8] sm:$0xff] %v285_v6 }
  0x47   :  { %318 = vst [vmem:[#allocation7 + $0xf0] sm:$0xff] %v286_v10 }
  0x48   :  { %319 = vst [vmem:[#allocation7 + $0xf8] sm:$0xff] %v287_v9 }
  0x49   :  { %332 = dma.vmem_to_hbm [thread:$0]  %s325_s22, 4096, %s327_s25, [#allocation4], %s432_s17, %s432_s17, %s433_s18  }
  0x4a   :  { %429 = dma.done.wait [#allocation4], 4096  }
  0x4b   :  { %430 = vsyncadd [#allocation4], 4294963200 }
  0x4c   :  { %337 = vsyncpa [#allocation3], 1 }
  0x4d   :  { %338 = vsyncpa [#allocation6], 1 }
  0x4e   :  { %339 = vsyncpa [#allocation4], 1 }

</bundles_post_ra>
